<compile_context>
chip_gen: v7x
topology: tpu7x:2x2x1
jax: 0.10.0
libtpu: 0.0.40
codegen_flags: <defaults>
</compile_context>

<pallas_src>
import functools

import jax
import jax.numpy as jnp
from jax.experimental import pallas as pl
from jax.experimental.pallas import tpu as pltpu


def _round_up(v, m):
    return (v + m - 1) // m * m


def make_attention_kernel(*, n_num, batch, tile_b, steps_per_split, ew_dtype):
    """Kernel factory closing over static shape constants."""
    inv_b = 1.0 / float(batch)
    mxu_dtype = jnp.bfloat16

    def kernel(x_ref, w1_ref, b1_ref, w2_ref, b2_ref, w3_ref, b3_ref, out_ref):
        c = pl.program_id(0)   # batch split (maps to a TensorCore on v7x)
        s = pl.program_id(1)   # batch tile within the split (accumulation axis)

        # Per-split output block is resident across the arbitrary axis: init once.
        @pl.when(s == 0)
        def _():
            out_ref[...] = jnp.zeros_like(out_ref)

        # x streamed in its HBM dtype; cast to bf16 in-kernel (cheap VALU, hidden
        # under the matmuls) instead of a separate padded-copy pass in the wrapper.
        x = x_ref[...].astype(mxu_dtype)                                  # (TILE_B, IN_PAD)

        # fc1 + LeakyReLU (negative_slope = 0.01, PyTorch default)
        h1 = jnp.dot(x, w1_ref[...], preferred_element_type=jnp.float32) + b1_ref[...]
        h1 = jnp.where(h1 > 0, h1, 0.01 * h1)                             # (TILE_B, H1_PAD) f32

        # fc2 + LeakyReLU (bf16 MXU inputs, f32 accumulation)
        h2 = jnp.dot(h1.astype(mxu_dtype), w2_ref[...],
                     preferred_element_type=jnp.float32) + b2_ref[...]
        h2 = jnp.where(h2 > 0, h2, 0.01 * h2)                             # (TILE_B, H2_PAD) f32

        # fc3 + sigmoid
        h3 = jnp.dot(h2.astype(mxu_dtype), w3_ref[...],
                     preferred_element_type=jnp.float32) + b3_ref[...]    # (TILE_B, N_PAD) f32

        # Transcendental chain: bf16 on v6e/v7x (bf16 EUP), f32 on v5e.
        sgm = jax.nn.sigmoid(h3.astype(ew_dtype))
        e = jnp.exp(sgm).astype(jnp.float32)

        # softmax over the first n_num logical columns (T = 1).  sigmoid output is
        # bounded in (0,1) so no max-subtraction is needed.
        col = jax.lax.broadcasted_iota(jnp.int32, e.shape, 1)
        e = jnp.where(col < n_num, e, 0.0)
        denom = jnp.sum(e, axis=1, keepdims=True)
        att = e * pl.reciprocal(denom, approx=True)                        # rows sum to ~1

        # Mask out-of-range batch rows (ragged last tile / fully-OOB clamped tiles),
        # then accumulate this split's share of the batch mean.
        row_start = (c * steps_per_split + s) * tile_b
        row = jax.lax.broadcasted_iota(jnp.int32, e.shape, 0) + row_start
        att = jnp.where(row < batch, att, 0.0)

        out_ref[...] += (jnp.sum(att, axis=0, keepdims=True) * inv_b)[None]

    return kernel


@functools.partial(jax.jit, static_argnames=("tile_b",))
def attention_layer(x, w1, b1, w2, b2, w3, b3, *, tile_b=None):
    """x: (B, n_num*last_dim) f32.  Weights (in, out) = transposed PyTorch layout.

    Returns shape (n_num,) = torch.mean(softmax(...), dim=0, keepdim=True).squeeze().
    """
    B, in_dim = x.shape
    h1_dim = w1.shape[1]
    h2_dim = w2.shape[1]
    n_num = w3.shape[1]

    IN_PAD = _round_up(in_dim, 128)
    H1_PAD = _round_up(h1_dim, 128)   # 500 -> 512
    H2_PAD = _round_up(h2_dim, 128)   # 100 -> 128
    N_PAD = _round_up(n_num, 128)     # n_num -> 128 (lane-dense output)

    f32, bf16 = jnp.float32, jnp.bfloat16

    # --- per-generation hardware sizing -------------------------------------------
    try:
        vmem_cap = int(pltpu.get_tpu_info().vmem_capacity_bytes)
    except Exception:
        vmem_cap = 64 << 20            # conservative fallback (v7x per-TC physical)
    try:
        kind = jax.devices()[0].device_kind.lower()
    except Exception:
        kind = ""
    # bf16 transcendentals only where the EUP supports bf16 (v6e / v7x); f32 on v5e.
    ew_dtype = bf16 if any(t in kind for t in ("v6", "v7", "7x")) else f32

    pad_x = (in_dim != IN_PAD)
    x_bytes = 2 if pad_x else x.dtype.itemsize

    # Rough per-batch-row VMEM footprint: double-buffered x tile + f32/bf16 intermediates.
    per_row = 2 * IN_PAD * x_bytes + 6 * H1_PAD + 6 * H2_PAD + 20 * N_PAD
    weight_bytes = (4 * (IN_PAD * H1_PAD + H1_PAD * H2_PAD + H2_PAD * N_PAD)
                    + 16 * (H1_PAD + H2_PAD + N_PAD))
    if tile_b is None:
        budget = max(vmem_cap // 2 - weight_bytes, 1 << 20)
        tile_cap = max(64, min(2048, budget // per_row // 8 * 8))
        tile_b = int(min(tile_cap, _round_up(B, 8)))
    tile_b = max(8, _round_up(int(tile_b), 8))

    total_steps = pl.cdiv(B, tile_b)
    # Split the batch range across (up to) two TensorCores (v7x megacore).  On 1-TC
    # chips this is just one extra cheap accumulator row.
    num_splits = 2 if total_steps >= 2 else 1
    spc = pl.cdiv(total_steps, num_splits)
    grid = (num_splits, spc)

    # x index map: contiguous range of batch tiles per split.  If total_steps is odd,
    # the last split has one fully-out-of-range tile: clamp its block index back in
    # range (harmless duplicate read) -- the in-kernel row mask zeroes its contribution.
    if num_splits * spc == total_steps:
        x_index = lambda c, s: (c * spc + s, 0)
    else:
        last = total_steps - 1
        x_index = lambda c, s: (jnp.minimum(c * spc + s, last), 0)

    # --- operand prep ---------------------------------------------------------------
    if pad_x:
        # Feature dim not lane-aligned: one-time padded bf16 copy (cold path).
        x_in = jnp.zeros((B, IN_PAD), bf16).at[:, :in_dim].set(x.astype(bf16))
    else:
        # Common case: stream x straight from HBM, cast to bf16 in-kernel.
        x_in = x

    # Zero-padding: padded weight rows feeding the next layer and padded bias lanes MUST
    # be zero so they do not leak into h2/h3; softmax columns are masked in-kernel.
    w1p = jnp.zeros((IN_PAD, H1_PAD), bf16).at[:in_dim, :h1_dim].set(w1.astype(bf16))
    w2p = jnp.zeros((H1_PAD, H2_PAD), bf16).at[:h1_dim, :h2_dim].set(w2.astype(bf16))
    w3p = jnp.zeros((H2_PAD, N_PAD), bf16).at[:h2_dim, :n_num].set(w3.astype(bf16))
    b1p = jnp.zeros((1, H1_PAD), f32).at[:, :h1_dim].set(b1.reshape(1, -1).astype(f32))
    b2p = jnp.zeros((1, H2_PAD), f32).at[:, :h2_dim].set(b2.reshape(1, -1).astype(f32))
    b3p = jnp.zeros((1, N_PAD), f32).at[:, :n_num].set(b3.reshape(1, -1).astype(f32))

    # Explicit scoped-VMEM limit: default is only 16/32 MiB; size from actual footprint.
    vmem_need = tile_b * per_row + 2 * weight_bytes + (4 << 20)
    vmem_limit = int(min(int(vmem_cap * 0.9), max(32 << 20, vmem_need + (16 << 20))))

    kernel = make_attention_kernel(n_num=n_num, batch=B, tile_b=tile_b,
                                   steps_per_split=spc, ew_dtype=ew_dtype)

    rows = num_splits * spc * tile_b
    flops = 2 * rows * (IN_PAD * H1_PAD + H1_PAD * H2_PAD + H2_PAD * N_PAD)
    transcendentals = 3 * rows * N_PAD  # sigmoid exp + softmax exp + reciprocal
    bytes_accessed = (B * IN_PAD * x_bytes
                      + 2 * (IN_PAD * H1_PAD + H1_PAD * H2_PAD + H2_PAD * N_PAD)
                      + 4 * (H1_PAD + H2_PAD + N_PAD)
                      + num_splits * N_PAD * 4)

    out = pl.pallas_call(
        kernel,
        out_shape=jax.ShapeDtypeStruct((num_splits, 1, N_PAD), f32),
        grid_spec=pltpu.PrefetchScalarGridSpec(
            num_scalar_prefetch=0,
            grid=grid,
            in_specs=[
                pl.BlockSpec((tile_b, IN_PAD), x_index),          # x: streamed over batch
                pl.BlockSpec((IN_PAD, H1_PAD), lambda c, s: (0, 0)),  # weights/biases resident
                pl.BlockSpec((1, H1_PAD), lambda c, s: (0, 0)),
                pl.BlockSpec((H1_PAD, H2_PAD), lambda c, s: (0, 0)),
                pl.BlockSpec((1, H2_PAD), lambda c, s: (0, 0)),
                pl.BlockSpec((H2_PAD, N_PAD), lambda c, s: (0, 0)),
                pl.BlockSpec((1, N_PAD), lambda c, s: (0, 0)),
            ],
            out_specs=pl.BlockSpec((1, 1, N_PAD), lambda c, s: (c, 0, 0)),  # per-split acc
        ),
        compiler_params=pltpu.CompilerParams(
            dimension_semantics=("parallel", "arbitrary"),
            vmem_limit_bytes=vmem_limit,
        ),
        cost_estimate=pl.CostEstimate(
            flops=flops,
            transcendentals=transcendentals,
            bytes_accessed=bytes_accessed,
        ),
    )(x_in, w1p, b1p, w2p, b2p, w3p, b3p)

    # Reduce the per-split partials and strip padding: (splits, 1, N_PAD) -> (n_num,)
    return jnp.sum(out, axis=0)[0, :n_num]


def attention_layer_ref(x, w1, b1, w2, b2, w3, b3):
    """Pure-JAX f32 reference of the PyTorch forward pass."""
    h1 = x @ w1 + b1.reshape(1, -1)
    h1 = jnp.where(h1 > 0, h1, 0.01 * h1)
    h2 = h1 @ w2 + b2.reshape(1, -1)
    h2 = jnp.where(h2 > 0, h2, 0.01 * h2)
    s = jax.nn.sigmoid(h2 @ w3 + b3.reshape(1, -1))
    att = jax.nn.softmax(s, axis=1)
    return jnp.mean(att, axis=0)


def kaiming_normal(key, fan_in, fan_out):
    # torch.nn.init.kaiming_normal_ default: std = sqrt(2 / fan_in); stored as (in, out).
    std = jnp.sqrt(2.0 / fan_in)
    return jax.random.normal(key, (fan_in, fan_out), dtype=jnp.float32) * std


if __name__ == "__main__":
    # Small shapes consistent with the module.
    B, last_dim, n_num = 8, 32, 4
    in_dim = n_num * last_dim  # 128

    key = jax.random.PRNGKey(0)
    kx, k1, k2, k3, kb1, kb2, kb3 = jax.random.split(key, 7)

    x = jax.random.normal(kx, (B, in_dim), dtype=jnp.float32)

    w1 = kaiming_normal(k1, in_dim, 500)
    w2 = kaiming_normal(k2, 500, 100)
    w3 = kaiming_normal(k3, 100, n_num)
    # biases ~ PyTorch default U(-1/sqrt(fan_in), 1/sqrt(fan_in))
    b1 = jax.random.uniform(kb1, (1, 500), jnp.float32, -1.0, 1.0) / jnp.sqrt(in_dim * 1.0)
    b2 = jax.random.uniform(kb2, (1, 100), jnp.float32, -1.0, 1.0) / jnp.sqrt(500.0)
    b3 = jax.random.uniform(kb3, (1, n_num), jnp.float32, -1.0, 1.0) / jnp.sqrt(100.0)

    out = attention_layer(x, w1, b1, w2, b2, w3, b3)
    out = jax.block_until_ready(out)
    ref = attention_layer_ref(x, w1, b1, w2, b2, w3, b3)

    assert out.shape == (n_num,)
    # softmax rows sum to 1 -> batch-mean sums to 1 (approx reciprocal + bf16 tolerance)
    assert abs(float(jnp.sum(out)) - 1.0) < 5e-3, float(jnp.sum(out))
    max_err = float(jnp.max(jnp.abs(out - ref)))
    assert max_err < 2e-2, max_err

    # Larger batch: exercises the multi-step accumulation, the 2-way (v7x) split and the
    # ragged last tile handled by the in-kernel row mask (no batch padding of x).
    B2 = 200
    x2 = jax.random.normal(jax.random.PRNGKey(1), (B2, in_dim), dtype=jnp.float32)
    out2 = jax.block_until_ready(attention_layer(x2, w1, b1, w2, b2, w3, b3, tile_b=64))
    ref2 = attention_layer_ref(x2, w1, b1, w2, b2, w3, b3)
    assert out2.shape == (n_num,)
    assert abs(float(jnp.sum(out2)) - 1.0) < 5e-3, float(jnp.sum(out2))
    max_err2 = float(jnp.max(jnp.abs(out2 - ref2)))
    assert max_err2 < 2e-2, max_err2

    print("KERNEL_OK")
</pallas_src>

<mosaic_0001>
module attributes {stable_mosaic.version = 11 : i64} {
  func.func @kernel(%arg0: i32, %arg1: i32, %arg2: memref<8x128xf32, #tpu.memory_space<vmem>>, %arg3: memref<128x512xbf16, #tpu.memory_space<vmem>>, %arg4: memref<1x512xf32, #tpu.memory_space<vmem>>, %arg5: memref<512x128xbf16, #tpu.memory_space<vmem>>, %arg6: memref<1x128xf32, #tpu.memory_space<vmem>>, %arg7: memref<128x128xbf16, #tpu.memory_space<vmem>>, %arg8: memref<1x128xf32, #tpu.memory_space<vmem>>, %arg9: memref<1x1x128xf32, #tpu.memory_space<vmem>>) attributes {dimension_semantics = [#tpu.dimension_semantics<parallel>, #tpu.dimension_semantics<arbitrary>], iteration_bounds = array<i64: 1, 1>, scalar_prefetch = 0 : i64, scratch_operands = 0 : i64, tpu.core_type = #tpu.core_type<tc>, window_params = [{transform_indices = @transform_0, window_bounds = array<i64: 8, 128>}, {pipeline_mode = #tpu.pipeline_mode<synchronous>, transform_indices = @transform_1, window_bounds = array<i64: 128, 512>}, {pipeline_mode = #tpu.pipeline_mode<synchronous>, transform_indices = @transform_2, window_bounds = array<i64: 1, 512>}, {pipeline_mode = #tpu.pipeline_mode<synchronous>, transform_indices = @transform_3, window_bounds = array<i64: 512, 128>}, {pipeline_mode = #tpu.pipeline_mode<synchronous>, transform_indices = @transform_4, window_bounds = array<i64: 1, 128>}, {pipeline_mode = #tpu.pipeline_mode<synchronous>, transform_indices = @transform_5, window_bounds = array<i64: 128, 128>}, {pipeline_mode = #tpu.pipeline_mode<synchronous>, transform_indices = @transform_6, window_bounds = array<i64: 1, 128>}, {transform_indices = @transform_7, window_bounds = array<i64: 1, 1, 128>}]} {
    %c0_i32 = arith.constant 0 : i32
    %0 = arith.cmpi eq, %arg1, %c0_i32 : i32
    %1 = arith.extui %0 : i1 to i32
    %c0_i32_0 = arith.constant 0 : i32
    %2 = arith.cmpi ne, %1, %c0_i32_0 : i32
    scf.if %2 {
      %cst_33 = arith.constant 0.000000e+00 : f32
      %66 = vector.broadcast %cst_33 : f32 to vector<1x1x128xf32>
      %c0_34 = arith.constant 0 : index
      %c0_35 = arith.constant 0 : index
      %c0_36 = arith.constant 0 : index
      %67 = vector.load %arg9[%c0_34, %c0_35, %c0_36] : memref<1x1x128xf32, #tpu.memory_space<vmem>>, vector<1x1x128xf32>
      tpu.vector_store %arg9[%c0_34, %c0_35, %c0_36], %66 {strides = array<i32>} : memref<1x1x128xf32, #tpu.memory_space<vmem>>, vector<1x1x128xf32>,
    } else {
    }
    %c0 = arith.constant 0 : index
    %c0_1 = arith.constant 0 : index
    %3 = vector.load %arg2[%c0, %c0_1] : memref<8x128xf32, #tpu.memory_space<vmem>>, vector<8x128xf32>
    %4 = arith.truncf %3 : vector<8x128xf32> to vector<8x128xbf16>
    %c0_2 = arith.constant 0 : index
    %c0_3 = arith.constant 0 : index
    %5 = vector.load %arg3[%c0_2, %c0_3] : memref<128x512xbf16, #tpu.memory_space<vmem>>, vector<128x512xbf16>
    %cst = arith.constant dense<0.000000e+00> : vector<8x512xf32>
    %6 = tpu.matmul %4, %5, %cst {dimension_numbers = #tpu.dot_dimension_numbers<[1], [0], [0], [1], [0, 0, 1, 1], [], []>} : vector<8x128xbf16>, vector<128x512xbf16>, vector<8x512xf32> -> vector<8x512xf32>
    %c0_4 = arith.constant 0 : index
    %c0_5 = arith.constant 0 : index
    %7 = vector.load %arg4[%c0_4, %c0_5] : memref<1x512xf32, #tpu.memory_space<vmem>>, vector<1x512xf32>
    %8 = vector.broadcast %7 : vector<1x512xf32> to vector<8x512xf32>
    %9 = arith.addf %6, %8 : vector<8x512xf32>
    %cst_6 = arith.constant 0.000000e+00 : f32
    %10 = vector.broadcast %cst_6 : f32 to vector<8x512xf32>
    %11 = arith.cmpf ogt, %9, %10 : vector<8x512xf32>
    %cst_7 = arith.constant 0.00999999977 : f32
    %12 = vector.broadcast %cst_7 : f32 to vector<8x512xf32>
    %13 = arith.mulf %12, %9 : vector<8x512xf32>
    %14 = arith.select %11, %9, %13 : vector<8x512xi1>, vector<8x512xf32>
    %15 = arith.truncf %14 : vector<8x512xf32> to vector<8x512xbf16>
    %c0_8 = arith.constant 0 : index
    %c0_9 = arith.constant 0 : index
    %16 = vector.load %arg5[%c0_8, %c0_9] : memref<512x128xbf16, #tpu.memory_space<vmem>>, vector<512x128xbf16>
    %cst_10 = arith.constant dense<0.000000e+00> : vector<8x128xf32>
    %17 = tpu.matmul %15, %16, %cst_10 {dimension_numbers = #tpu.dot_dimension_numbers<[1], [0], [0], [1], [0, 0, 1, 1], [], []>} : vector<8x512xbf16>, vector<512x128xbf16>, vector<8x128xf32> -> vector<8x128xf32>
    %c0_11 = arith.constant 0 : index
    %c0_12 = arith.constant 0 : index
    %18 = vector.load %arg6[%c0_11, %c0_12] : memref<1x128xf32, #tpu.memory_space<vmem>>, vector<1x128xf32>
    %19 = vector.broadcast %18 : vector<1x128xf32> to vector<8x128xf32>
    %20 = arith.addf %17, %19 : vector<8x128xf32>
    %cst_13 = arith.constant 0.000000e+00 : f32
    %21 = vector.broadcast %cst_13 : f32 to vector<8x128xf32>
    %22 = arith.cmpf ogt, %20, %21 : vector<8x128xf32>
    %cst_14 = arith.constant 0.00999999977 : f32
    %23 = vector.broadcast %cst_14 : f32 to vector<8x128xf32>
    %24 = arith.mulf %23, %20 : vector<8x128xf32>
    %25 = arith.select %22, %20, %24 : vector<8x128xi1>, vector<8x128xf32>
    %26 = arith.truncf %25 : vector<8x128xf32> to vector<8x128xbf16>
    %c0_15 = arith.constant 0 : index
    %c0_16 = arith.constant 0 : index
    %27 = vector.load %arg7[%c0_15, %c0_16] : memref<128x128xbf16, #tpu.memory_space<vmem>>, vector<128x128xbf16>
    %cst_17 = arith.constant dense<0.000000e+00> : vector<8x128xf32>
    %28 = tpu.matmul %26, %27, %cst_17 {dimension_numbers = #tpu.dot_dimension_numbers<[1], [0], [0], [1], [0, 0, 1, 1], [], []>} : vector<8x128xbf16>, vector<128x128xbf16>, vector<8x128xf32> -> vector<8x128xf32>
    %c0_18 = arith.constant 0 : index
    %c0_19 = arith.constant 0 : index
    %29 = vector.load %arg8[%c0_18, %c0_19] : memref<1x128xf32, #tpu.memory_space<vmem>>, vector<1x128xf32>
    %30 = vector.broadcast %29 : vector<1x128xf32> to vector<8x128xf32>
    %31 = arith.addf %28, %30 : vector<8x128xf32>
    %32 = arith.negf %31 : vector<8x128xf32>
    %33 = math.exp %32 : vector<8x128xf32>
    %cst_20 = arith.constant 1.000000e+00 : f32
    %34 = vector.broadcast %cst_20 : f32 to vector<8x128xf32>
    %35 = arith.addf %34, %33 : vector<8x128xf32>
    %36 = arith.divf %34, %35 : vector<8x128xf32>
    %37 = math.exp %36 : vector<8x128xf32>
    %38 = tpu.iota {dimensions = array<i32: 1>} : vector<8x128xi32>
    %c4_i32 = arith.constant 4 : i32
    %39 = vector.broadcast %c4_i32 : i32 to vector<8x128xi32>
    %40 = arith.cmpi slt, %38, %39 : vector<8x128xi32>
    %cst_21 = arith.constant 0.000000e+00 : f32
    %41 = vector.broadcast %cst_21 : f32 to vector<8x128xf32>
    %42 = arith.select %40, %37, %41 : vector<8x128xi1>, vector<8x128xf32>
    %cst_22 = arith.constant dense<0.000000e+00> : vector<8xf32>
    %43 = vector.multi_reduction <add>, %42, %cst_22 [1] : vector<8x128xf32> to vector<8xf32>
    %44 = vector.shape_cast %43 : vector<8xf32> to vector<8x1xf32>
    %45 = tpu.reciprocal %44 {approx = true} : vector<8x1xf32> -> vector<8x1xf32>
    %46 = vector.broadcast %45 : vector<8x1xf32> to vector<8x128xf32>
    %47 = arith.mulf %42, %46 : vector<8x128xf32>
    %c1_i32 = arith.constant 1 : i32
    %48 = arith.muli %arg0, %c1_i32 : i32
    %49 = arith.addi %48, %arg1 : i32
    %c8_i32 = arith.constant 8 : i32
    %50 = arith.muli %49, %c8_i32 : i32
    %51 = tpu.iota {dimensions = array<i32: 0>} : vector<8x128xi32>
    %52 = vector.broadcast %50 : i32 to vector<8x128xi32>
    %53 = arith.addi %51, %52 : vector<8x128xi32>
    %c8_i32_23 = arith.constant 8 : i32
    %54 = vector.broadcast %c8_i32_23 : i32 to vector<8x128xi32>
    %55 = arith.cmpi slt, %53, %54 : vector<8x128xi32>
    %cst_24 = arith.constant 0.000000e+00 : f32
    %56 = vector.broadcast %cst_24 : f32 to vector<8x128xf32>
    %57 = arith.select %55, %47, %56 : vector<8x128xi1>, vector<8x128xf32>
    %c0_25 = arith.constant 0 : index
    %c0_26 = arith.constant 0 : index
    %c0_27 = arith.constant 0 : index
    %58 = vector.load %arg9[%c0_25, %c0_26, %c0_27] : memref<1x1x128xf32, #tpu.memory_space<vmem>>, vector<1x1x128xf32>
    %cst_28 = arith.constant dense<0.000000e+00> : vector<128xf32>
    %59 = vector.multi_reduction <add>, %57, %cst_28 [0] : vector<8x128xf32> to vector<128xf32>
    %60 = vector.shape_cast %59 : vector<128xf32> to vector<1x128xf32>
    %cst_29 = arith.constant 1.250000e-01 : f32
    %61 = vector.broadcast %cst_29 : f32 to vector<1x128xf32>
    %62 = arith.mulf %60, %61 : vector<1x128xf32>
    %63 = vector.shape_cast %62 : vector<1x128xf32> to vector<1x1x128xf32>
    %64 = arith.addf %58, %63 : vector<1x1x128xf32>
    %c0_30 = arith.constant 0 : index
    %c0_31 = arith.constant 0 : index
    %c0_32 = arith.constant 0 : index
    %65 = vector.load %arg9[%c0_30, %c0_31, %c0_32] : memref<1x1x128xf32, #tpu.memory_space<vmem>>, vector<1x1x128xf32>
    tpu.vector_store %arg9[%c0_30, %c0_31, %c0_32], %64 {strides = array<i32>} : memref<1x1x128xf32, #tpu.memory_space<vmem>>, vector<1x1x128xf32>,
    return
  }
  func.func @transform_0(%arg0: i32, %arg1: i32) -> (i32, i32) {
    %c1_i32 = arith.constant 1 : i32
    %0 = arith.muli %arg0, %c1_i32 : i32
    %1 = arith.addi %0, %arg1 : i32
    %c0_i32 = arith.constant 0 : i32
    %c0_i32_0 = arith.constant 0 : i32
    return %1, %c0_i32 : i32, i32
  }
  func.func @transform_1(%arg0: i32, %arg1: i32) -> (i32, i32) {
    %c0_i32 = arith.constant 0 : i32
    %c0_i32_0 = arith.constant 0 : i32
    %c0_i32_1 = arith.constant 0 : i32
    return %c0_i32, %c0_i32_0 : i32, i32
  }
  func.func @transform_2(%arg0: i32, %arg1: i32) -> (i32, i32) {
    %c0_i32 = arith.constant 0 : i32
    %c0_i32_0 = arith.constant 0 : i32
    %c0_i32_1 = arith.constant 0 : i32
    return %c0_i32, %c0_i32_0 : i32, i32
  }
  func.func @transform_3(%arg0: i32, %arg1: i32) -> (i32, i32) {
    %c0_i32 = arith.constant 0 : i32
    %c0_i32_0 = arith.constant 0 : i32
    %c0_i32_1 = arith.constant 0 : i32
    return %c0_i32, %c0_i32_0 : i32, i32
  }
  func.func @transform_4(%arg0: i32, %arg1: i32) -> (i32, i32) {
    %c0_i32 = arith.constant 0 : i32
    %c0_i32_0 = arith.constant 0 : i32
    %c0_i32_1 = arith.constant 0 : i32
    return %c0_i32, %c0_i32_0 : i32, i32
  }
  func.func @transform_5(%arg0: i32, %arg1: i32) -> (i32, i32) {
    %c0_i32 = arith.constant 0 : i32
    %c0_i32_0 = arith.constant 0 : i32
    %c0_i32_1 = arith.constant 0 : i32
    return %c0_i32, %c0_i32_0 : i32, i32
  }
  func.func @transform_6(%arg0: i32, %arg1: i32) -> (i32, i32) {
    %c0_i32 = arith.constant 0 : i32
    %c0_i32_0 = arith.constant 0 : i32
    %c0_i32_1 = arith.constant 0 : i32
    return %c0_i32, %c0_i32_0 : i32, i32
  }
  func.func @transform_7(%arg0: i32, %arg1: i32) -> (i32, i32, i32) {
    %c0_i32 = arith.constant 0 : i32
    %c0_i32_0 = arith.constant 0 : i32
    %c0_i32_1 = arith.constant 0 : i32
    return %arg0, %c0_i32, %c0_i32_0 : i32, i32, i32
  }
}

</mosaic_0001>

<bundles_post_ra>
// kernel: attention_layer.1
= control target key start
LH: loop header
LB: loop body
LE: loop exit
PB: predicated region body
PF: predicated region fallthrough
CT: control target
= control target key end

     0   :  { %v1112_v1 = vmov 0   ;;  %vm1114_vm4 = vmmov 0   ;;  %s1404_s1 = inlined_call_operand.vmem [shape: bf16[128,512], index: 1, kind: input, shape index: {}]   ;;  %s1405_s3 = inlined_call_operand.vmem [shape: bf16[512,128], index: 3, kind: input, shape index: {}]   ;;  %s1406_s0 = inlined_call_operand.vmem [shape: f32[8,128], index: 0, kind: input, shape index: {}]   ;;  %s1407_s5 = inlined_call_operand.vmem [shape: bf16[128,128], index: 5, kind: input, shape index: {}]   ;;  %s1408_s2 = inlined_call_operand.vmem [shape: f32[1,512], index: 2, kind: input, shape index: {}]   ;;  %s1409_s4 = inlined_call_operand.vmem [shape: f32[1,128], index: 4, kind: input, shape index: {}]   ;;  %s1410_s7 = inlined_call_operand.vmem [shape: f32[1,1,128], index: 7, kind: output, shape index: {}]   ;;  %s1411_s6 = inlined_call_operand.vmem [shape: f32[1,128], index: 6, kind: input, shape index: {}]  }
   0x1   :  { %v1016_v0 = vld [vmem:[%s1404_s1 + $0x4] ss:$16 sps:$4 sm:$0xff]   ;;  %297 = vmatprep.mubr.bf16.mxu0 %v1112_v1  ;;  %338 = vmatprep.mubr.bf16.mxu1 %v1112_v1  ;;  %v1018_v2 = vld [vmem:[%s1404_s1 + $0xc] ss:$16 sps:$4 sm:$0xff]   ;;  %v1020_v3 = vld [vmem:[%s1404_s1] ss:$16 sps:$4 sm:$0xff]  }
   0x2   :  { %265 = vmatprep.subr.bf16.mxu0 %v1016_v0  ;;  %v1021_v4 = vld [vmem:[%s1404_s1 + $0x8] ss:$16 sps:$4 sm:$0xff]   ;;  %306 = vmatprep.subr.bf16.mxu1 %v1018_v2  ;;  %v1022_v5 = vld [vmem:[%s1404_s1 + $0x24] ss:$16 sps:$4 sm:$0xff]   ;;  %v1024_v6 = vld [vmem:[%s1404_s1 + $0x2c] ss:$16 sps:$4 sm:$0xff]  }
   0x3   :  { %266 = vmatpush1.bf16.msra.mxu0 %v1020_v3  ;;  %307 = vmatpush1.bf16.msra.mxu1 %v1021_v4  ;;  %v1026_v7 = vld [vmem:[%s1404_s1 + $0x20] ss:$16 sps:$4 sm:$0xff]   ;;  %v1027_v8 = vld [vmem:[%s1404_s1 + $0x28] ss:$16 sps:$4 sm:$0xff]   ;;  %v1028_v9 = vld [vmem:[%s1404_s1 + $0x44] ss:$16 sps:$4 sm:$0xff]   ;;  %v85_v4 = vlaneseq }
   0x4   :  { %267 = vmatprep.subr.bf16.mxu0 %v1022_v5  ;;  %308 = vmatprep.subr.bf16.mxu1 %v1024_v6  ;;  %v1030_v10 = vld [vmem:[%s1404_s1 + $0x4c] ss:$16 sps:$4 sm:$0xff]   ;;  %v1032_v11 = vld [vmem:[%s1404_s1 + $0x40] ss:$16 sps:$4 sm:$0xff]   ;;  %v1033_v12 = vld [vmem:[%s1404_s1 + $0x48] ss:$16 sps:$4 sm:$0xff]  }
   0x5   :  { %v1034_v13 = vld [vmem:[%s1404_s1 + $0x64] ss:$16 sps:$4 sm:$0xff]   ;;  %v1036_v14 = vld [vmem:[%s1404_s1 + $0x6c] ss:$16 sps:$4 sm:$0xff]   ;;  %v1038_v15 = vld [vmem:[%s1404_s1 + $0x60] ss:$16 sps:$4 sm:$0xff]  }
   0x6   :  { %v1039_v16 = vld [vmem:[%s1404_s1 + $0x68] ss:$16 sps:$4 sm:$0xff]   ;;  %v1040_v17 = vld [vmem:[%s1404_s1 + $0x84] ss:$16 sps:$4 sm:$0xff]   ;;  %v1042_v18 = vld [vmem:[%s1404_s1 + $0x8c] ss:$16 sps:$4 sm:$0xff]  }
   0x7   :  { %268 = vmatpush1.bf16.msra.mxu0 %v1026_v7  ;;  %309 = vmatpush1.bf16.msra.mxu1 %v1027_v8  ;;  %v1044_v19 = vld [vmem:[%s1404_s1 + $0x80] ss:$16 sps:$4 sm:$0xff]   ;;  %v1045_v20 = vld [vmem:[%s1404_s1 + $0x88] ss:$16 sps:$4 sm:$0xff]   ;;  %v1046_v21 = vld [vmem:[%s1404_s1 + $0xa4] ss:$16 sps:$4 sm:$0xff]  }
   0x8   :  { %269 = vmatprep.subr.bf16.mxu0 %v1028_v9  ;;  %310 = vmatprep.subr.bf16.mxu1 %v1030_v10  ;;  %v1048_v22 = vld [vmem:[%s1404_s1 + $0xac] ss:$16 sps:$4 sm:$0xff]   ;;  %v1050_v23 = vld [vmem:[%s1404_s1 + $0xa0] ss:$16 sps:$4 sm:$0xff]   ;;  %v1051_v24 = vld [vmem:[%s1404_s1 + $0xa8] ss:$16 sps:$4 sm:$0xff]  }
   0x9   :  { %v1052_v25 = vld [vmem:[%s1404_s1 + $0xc4] ss:$16 sps:$4 sm:$0xff]   ;;  %v1054_v26 = vld [vmem:[%s1404_s1 + $0xcc] ss:$16 sps:$4 sm:$0xff]   ;;  %v1056_v27 = vld [vmem:[%s1404_s1 + $0xc0] ss:$16 sps:$4 sm:$0xff]  }
   0xa   :  { %v1057_v28 = vld [vmem:[%s1404_s1 + $0xc8] ss:$16 sps:$4 sm:$0xff]   ;;  %v1058_v29 = vld [vmem:[%s1404_s1 + $0xe4] ss:$16 sps:$4 sm:$0xff]   ;;  %v1060_v30 = vld [vmem:[%s1404_s1 + $0xec] ss:$16 sps:$4 sm:$0xff]  }
   0xb   :  { %270 = vmatpush1.bf16.msra.mxu0 %v1032_v11  ;;  %311 = vmatpush1.bf16.msra.mxu1 %v1033_v12  ;;  %v1062_v31 = vld [vmem:[%s1404_s1 + $0xe0] ss:$16 sps:$4 sm:$0xff]   ;;  %v1063_v32 = vld [vmem:[%s1404_s1 + $0xe8] ss:$16 sps:$4 sm:$0xff]   ;;  %v1113_v3 = vmov 0.0   ;;  %v86_v5 = vshrl.u32 %v85_v4, 7 }
   0xc   :  { %271 = vmatprep.subr.bf16.mxu0 %v1034_v13  ;;  %312 = vmatprep.subr.bf16.mxu1 %v1036_v14  ;;  %v49_v33 = vld [vmem:[%s1406_s0] sm:$0xff]  ;;  %v1068_v39 = vld [vmem:[%s1405_s3 + $0x48] sm:$0xff]   ;;  %v1072_v43 = vld [vmem:[%s1405_s3 + $0x50] sm:$0xff]   ;;  %48 = vst [vmem:[%s1410_s7] sm:$0x1] %v1113_v3 }
   0xd   :  { %v1064_v34 = vld [vmem:[%s1405_s3 + $0x40] sm:$0xff]   ;;  %v50_v37 = vpack.c.bf16 %v49_v33, %v49_v33  ;;  %v1069_v40 = vld [vmem:[%s1405_s3 + $0xc8] sm:$0xff]   ;;  %v1073_v44 = vld [vmem:[%s1405_s3 + $0xd0] sm:$0xff]   ;;  %v87_v6 = vsub.s32 0, %v86_v5  ;;  %v95_v7 = vsub.s32 2, %v86_v5  ;;  %v91_v9 = vsub.s32 1, %v86_v5 }
   0xe   :  { %v1065_v35 = vld [vmem:[%s1405_s3 + $0xc0] sm:$0xff]   ;;  %v1070_v41 = vld [vmem:[%s1405_s3 + $0x8] sm:$0xff]   ;;  %v1074_v45 = vld [vmem:[%s1405_s3 + $0x10] sm:$0xff]   ;;  %v99_v10 = vsub.s32 3, %v86_v5 }
   0xf   :  { %272 = vmatpush1.bf16.msra.mxu0 %v1038_v15  ;;  %313 = vmatpush1.bf16.msra.mxu1 %v1039_v16  ;;  %v1066_v36 = vld [vmem:[%s1405_s3] sm:$0xff]   ;;  %v1071_v42 = vld [vmem:[%s1405_s3 + $0x88] sm:$0xff]   ;;  %v1075_v46 = vld [vmem:[%s1405_s3 + $0x90] sm:$0xff]  }
  0x10   :  { %273 = vmatprep.subr.bf16.mxu0 %v1040_v17  ;;  %314 = vmatprep.subr.bf16.mxu1 %v1042_v18  ;;  %v1067_v38 = vld [vmem:[%s1405_s3 + $0x80] sm:$0xff]   ;;  %v1076_v47 = vld [vmem:[%s1405_s3 + $0x58] sm:$0xff]   ;;  %v1084_v55 = vld [vmem:[%s1405_s3 + $0x68] sm:$0xff]  }
  0x11   :  { %v1077_v48 = vld [vmem:[%s1405_s3 + $0xd8] sm:$0xff]   ;;  %v1080_v51 = vld [vmem:[%s1405_s3 + $0x60] sm:$0xff]   ;;  %v1085_v56 = vld [vmem:[%s1405_s3 + $0xe8] sm:$0xff]  }
  0x12   :  { %v1078_v49 = vld [vmem:[%s1405_s3 + $0x18] sm:$0xff]   ;;  %v1081_v52 = vld [vmem:[%s1405_s3 + $0xe0] sm:$0xff]   ;;  %v1086_v57 = vld [vmem:[%s1405_s3 + $0x28] sm:$0xff]  }
  0x13   :  { %274 = vmatpush1.bf16.msra.mxu0 %v1044_v19  ;;  %315 = vmatpush1.bf16.msra.mxu1 %v1045_v20  ;;  %v1079_v50 = vld [vmem:[%s1405_s3 + $0x98] sm:$0xff]   ;;  %v1082_v53 = vld [vmem:[%s1405_s3 + $0x20] sm:$0xff]   ;;  %v1087_v58 = vld [vmem:[%s1405_s3 + $0xa8] sm:$0xff]  }
  0x14   :  { %275 = vmatprep.subr.bf16.mxu0 %v1046_v21  ;;  %316 = vmatprep.subr.bf16.mxu1 %v1048_v22  ;;  %v1083_v54 = vld [vmem:[%s1405_s3 + $0xa0] sm:$0xff]   ;;  %v1088_v59 = vld [vmem:[%s1405_s3 + $0x70] sm:$0xff]   ;;  %v1092_v63 = vld [vmem:[%s1405_s3 + $0x78] sm:$0xff]  }
  0x15   :  { %v1089_v60 = vld [vmem:[%s1405_s3 + $0xf0] sm:$0xff]   ;;  %v1093_v0 = vld [vmem:[%s1405_s3 + $0xf8] sm:$0xff]   ;;  %v83_v8 = vld [vmem:[%s1408_s2] sm:$0xf] }
  0x16   :  { %v1090_v61 = vld [vmem:[%s1405_s3 + $0x30] sm:$0xff]   ;;  %v1094_v1 = vld [vmem:[%s1405_s3 + $0x38] sm:$0xff]   ;;  %v88_v11 = vrot.slane %v83_v8, %v87_v6  ;;  %v96_v12 = vrot.slane %v83_v8, %v95_v7  ;;  %v92_v13 = vrot.slane %v83_v8, %v91_v9  ;;  %v100_v14 = vrot.slane %v83_v8, %v99_v10 }
  0x17   :  { %276 = vmatpush1.bf16.msra.mxu0 %v1050_v23  ;;  %317 = vmatpush1.bf16.msra.mxu1 %v1051_v24  ;;  %v1091_v62 = vld [vmem:[%s1405_s3 + $0xb0] sm:$0xff]   ;;  %v1095_v2 = vld [vmem:[%s1405_s3 + $0xb8] sm:$0xff]  }
  0x18   :  { %277 = vmatprep.subr.bf16.mxu0 %v1052_v25  ;;  %318 = vmatprep.subr.bf16.mxu1 %v1054_v26 }
  0x1b   :  { %278 = vmatpush1.bf16.msra.mxu0 %v1056_v27  ;;  %319 = vmatpush1.bf16.msra.mxu1 %v1057_v28 }
  0x1c   :  { %279 = vmatprep.subr.bf16.mxu0 %v1058_v29  ;;  %320 = vmatprep.subr.bf16.mxu1 %v1060_v30 }
  0x1f   :  { %280 = vmatpush1.bf16.msra.mxu0 %v1062_v31  ;;  %321 = vmatpush1.bf16.msra.mxu1 %v1063_v32 }
  0x20   :  { %940 = vmatprep.subr.bf16.mxu0 %v1064_v34  ;;  %962 = vmatprep.subr.bf16.mxu1 %v1065_v35 }
  0x22   :  { %298 = vmatmul.mubr.bf16.vlgmr.msra.gmra.mrb[0].mxu0 %v50_v37  ;;  %339 = vmatmul.mubr.bf16.vlgmr.msra.gmra.mrb[0].mxu1 %v50_v37  ;;  %v1096_v37 = vld [vmem:[%s1407_s5] sm:$0xff]  }
  0x23   :  { %941 = vmatpush3.bf16.msra.mxu0 %v1066_v36  ;;  %963 = vmatpush3.bf16.msra.mxu1 %v1067_v38 }
  0x24   :  { %942 = vmatprep.subr.bf16.mxu0 %v1068_v39  ;;  %964 = vmatprep.subr.bf16.mxu1 %v1069_v40  ;;  %v1097_v40 = vld [vmem:[%s1407_s5 + $0x8] sm:$0xff]  }
  0x27   :  { %943 = vmatpush3.bf16.msra.mxu0 %v1070_v41  ;;  %965 = vmatpush3.bf16.msra.mxu1 %v1071_v42  ;;  %v1098_v41 = vld [vmem:[%s1407_s5 + $0x10] sm:$0xff]   ;;  %v1099_v42 = vld [vmem:[%s1407_s5 + $0x18] sm:$0xff]  }
  0x28   :  { %944 = vmatprep.subr.bf16.mxu0 %v1072_v43  ;;  %966 = vmatprep.subr.bf16.mxu1 %v1073_v44  ;;  %v1100_v43 = vld [vmem:[%s1407_s5 + $0x20] sm:$0xff]   ;;  %v1101_v44 = vld [vmem:[%s1407_s5 + $0x28] sm:$0xff]  }
  0x2b   :  { %945 = vmatpush3.bf16.msra.mxu0 %v1074_v45  ;;  %967 = vmatpush3.bf16.msra.mxu1 %v1075_v46  ;;  %v1102_v45 = vld [vmem:[%s1407_s5 + $0x30] sm:$0xff]   ;;  %v1103_v46 = vld [vmem:[%s1407_s5 + $0x38] sm:$0xff]  }
  0x2c   :  { %946 = vmatprep.subr.bf16.mxu0 %v1076_v47  ;;  %968 = vmatprep.subr.bf16.mxu1 %v1077_v48 }
  0x2f   :  { %947 = vmatpush3.bf16.msra.mxu0 %v1078_v49  ;;  %969 = vmatpush3.bf16.msra.mxu1 %v1079_v50  ;;  %v897_v49 = vld [vmem:[%s1409_s4] ss:$0 sm:$0xff] }
  0x30   :  { %948 = vmatprep.subr.bf16.mxu0 %v1080_v51  ;;  %970 = vmatprep.subr.bf16.mxu1 %v1081_v52 }
  0x33   :  { %949 = vmatpush3.bf16.msra.mxu0 %v1082_v53  ;;  %971 = vmatpush3.bf16.msra.mxu1 %v1083_v54 }
  0x34   :  { %950 = vmatprep.subr.bf16.mxu0 %v1084_v55  ;;  %972 = vmatprep.subr.bf16.mxu1 %v1085_v56 }
  0x37   :  { %951 = vmatpush3.bf16.msra.mxu0 %v1086_v57  ;;  %973 = vmatpush3.bf16.msra.mxu1 %v1087_v58 }
  0x38   :  { %952 = vmatprep.subr.bf16.mxu0 %v1088_v59  ;;  %974 = vmatprep.subr.bf16.mxu1 %v1089_v60 }
  0x3b   :  { %953 = vmatpush3.bf16.msra.mxu0 %v1090_v61  ;;  %975 = vmatpush3.bf16.msra.mxu1 %v1091_v62 }
  0x3c   :  { %954 = vmatprep.subr.bf16.mxu0 %v1092_v63  ;;  %976 = vmatprep.subr.bf16.mxu1 %v1093_v0  ;;  %v930_v63 = vld [vmem:[%s1411_s6] ss:$0 sm:$0xff] }
  0x3f   :  { %955 = vmatpush3.bf16.msra.mxu0 %v1094_v1  ;;  %977 = vmatpush3.bf16.msra.mxu1 %v1095_v2 }
  0x40   :  { %993 = vmatprep.subr.bf16.mxu0 %v1113_v3 }
  0xf5   :  { %v299_v15 = vpop.f32.mrb[0].mxu0  ;;  %v340_v16 = vpop.f32.mrb[0].mxu1 }
  0xf6   :  { %v300_v17 = vadd.f32 %v299_v15, %v88_v11  ;;  %v341_v18 = vadd.f32 %v340_v16, %v96_v12  ;;  %v301_v19 = vpop.f32.mrb[1].mxu0  ;;  %v342_v20 = vpop.f32.mrb[1].mxu1  ;;  %v830_v12 = vand.u32 127, %v85_v4 }
  0xf7   :  { %v302_v21 = vadd.f32 %v301_v19, %v92_v13  ;;  %v343_v22 = vadd.f32 %v342_v20, %v100_v14  ;;  %v303_v23 = vpop.f32.mrb[2].mxu0  ;;  %v344_v24 = vpop.f32.mrb[2].mxu1 }
  0xf8   :  { %vm347_vm0 = vcmp.gt.f32.partialorder %v300_v17, 0.0  ;;  %v351_v25 = vmul.f32 0.01, %v300_v17  ;;  %vm349_vm1 = vcmp.gt.f32.partialorder %v341_v18, 0.0  ;;  %v353_v26 = vmul.f32 0.01, %v341_v18 }
  0xf9   :  { %vm348_vm2 = vcmp.gt.f32.partialorder %v302_v21, 0.0  ;;  %v352_v27 = vmul.f32 0.01, %v302_v21  ;;  %vm350_vm3 = vcmp.gt.f32.partialorder %v343_v22, 0.0  ;;  %v354_v28 = vmul.f32 0.01, %v343_v22 }
  0xfa   :  { %v355_v29 = vsel %vm347_vm0, %v300_v17, %v351_v25  ;;  %v357_v30 = vsel %vm349_vm1, %v341_v18, %v353_v26  ;;  %v304_v31 = vpop.f32.mrb[3].mxu0  ;;  %v345_v32 = vpop.f32.mrb[3].mxu1  ;;  %vm831_vm6 = vcmp.lt.s32.totalorder %v830_v12, 4  ;;  %v845_v23 = vld [vmem:[%s1410_s7] sm:$0x1] }
  0xfb   :  { %v356_v33 = vsel %vm348_vm2, %v302_v21, %v352_v27  ;;  %v358_v34 = vsel %vm350_vm3, %v343_v22, %v354_v28  ;;  %v359_v38 = vpack.c.bf16 %v355_v29, %v355_v29  ;;  %v361_v39 = vpack.c.bf16 %v357_v30, %v357_v30 }
  0xfc   :  { %v360_v35 = vpack.c.bf16 %v356_v33, %v356_v33  ;;  %v362_v36 = vpack.c.bf16 %v358_v34, %v358_v34 }
  0xfe   :  { %658 = vmatprep.mubr.bf16.mxu0 %v360_v35  ;;  %698 = vmatprep.mubr.bf16.mxu1 %v362_v36 }
  0xff   :  { %659 = vmatmul.mubr.bf16.vlgmr.msra.gmra.mrb[4].mxu0 %v359_v38  ;;  %699 = vmatmul.mubr.bf16.vlgmr.msra.gmra.mrb[4].mxu1 %v361_v39 }
 0x100   :  { %994 = vmatpush3.bf16.msra.mxu0 %v1096_v37  ;;  %1009 = vmatprep.mubr.msk.bf16.mxu0 %vm1114_vm4, %v1113_v3 }
 0x101   :  { %995 = vmatprep.subr.bf16.mxu0 %v1113_v3 }
 0x104   :  { %996 = vmatpush3.bf16.msra.mxu0 %v1097_v40 }
 0x105   :  { %997 = vmatprep.subr.bf16.mxu0 %v1113_v3 }
 0x108   :  { %998 = vmatpush3.bf16.msra.mxu0 %v1098_v41 }
 0x109   :  { %999 = vmatprep.subr.bf16.mxu0 %v1113_v3 }
 0x10c   :  { %1000 = vmatpush3.bf16.msra.mxu0 %v1099_v42 }
 0x10d   :  { %1001 = vmatprep.subr.bf16.mxu0 %v1113_v3 }
 0x110   :  { %1002 = vmatpush3.bf16.msra.mxu0 %v1100_v43 }
 0x111   :  { %1003 = vmatprep.subr.bf16.mxu0 %v1113_v3 }
 0x114   :  { %1004 = vmatpush3.bf16.msra.mxu0 %v1101_v44 }
 0x115   :  { %1005 = vmatprep.subr.bf16.mxu0 %v1113_v3 }
 0x118   :  { %1006 = vmatpush3.bf16.msra.mxu0 %v1102_v45 }
 0x119   :  { %1007 = vmatprep.subr.bf16.mxu0 %v1113_v3 }
 0x11c   :  { %1008 = vmatpush3.bf16.msra.mxu0 %v1103_v46 }
 0x1d2   :  { %v956_v47 = vpop.f32.mrb[4].mxu0  ;;  %v978_v48 = vpop.f32.mrb[4].mxu1 }
 0x1d3   :  { %v957_v50 = vpop.f32.mrb[5].mxu0  ;;  %v979_v51 = vpop.f32.mrb[5].mxu1 }
 0x1d4   :  { %v958_v52 = vadd.f32 %v957_v50, %v956_v47  ;;  %v980_v53 = vadd.f32 %v979_v51, %v978_v48  ;;  %v959_v54 = vpop.f32.mrb[6].mxu0  ;;  %v981_v55 = vpop.f32.mrb[6].mxu1 }
 0x1d5   :  { %v960_v56 = vpop.f32.mrb[7].mxu0  ;;  %v982_v57 = vpop.f32.mrb[7].mxu1 }
 0x1d6   :  { %v661_v58 = vadd.f32 %v958_v52, %v897_v49 }
 0x1d8   :  { %v701_v59 = vadd.f32 %v980_v53, %v661_v58 }
 0x1da   :  { %vm706_vm5 = vcmp.gt.f32.partialorder %v701_v59, 0.0  ;;  %v707_v60 = vmul.f32 0.01, %v701_v59 }
 0x1dc   :  { %v708_v61 = vsel %vm706_vm5, %v701_v59, %v707_v60 }
 0x1dd   :  { %v709_v62 = vpack.c.bf16 %v708_v61, %v708_v61 }
 0x1df   :  { %1010 = vmatmul.mubr.bf16.vlgmr.msra.gmra.mrb[8].mxu0 %v709_v62 }
 0x2b2   :  { %v815_v0 = vpop.f32.mrb[8].mxu0 }
 0x2b3   :  { %v816_v1 = vadd.f32 %v930_v63, %v815_v0  ;;  %v1011_v2 = vpop.f32.mrb[9].mxu0 }
 0x2b4   :  { %v818_v5 = vpop.f32.mrb[10].mxu0 }
 0x2b5   :  { %v939_v6 = vmul.f32 -1.442695, %v816_v1  ;;  %v1012_v7 = vpop.f32.mrb[11].mxu0 }
 0x2b7   :  { %1104 = vpow2.f32 %v939_v6 }
 0x2c1   :  { %v1105_v8 = vpop.eup %1104 }
 0x2c2   :  { %v824_v9 = vadd.f32 1.0, %v1105_v8 }
 0x2c4   :  { %1106 = vrcp.f32 %v824_v9 }
 0x2ce   :  { %v1107_v10 = vpop.eup %1106 }
 0x2cf   :  { %v827_v11 = vmul.f32 1.442695, %v1107_v10 }
 0x2d1   :  { %1108 = vpow2.f32 %v827_v11 }
 0x2db   :  { %v1109_v3 = vpop.eup %1108 }
 0x2dc   :  { %v832_v13 = vsel %vm831_vm6, %v1109_v3, 0.0 }
 0x2dd   :  { %833 = vadd.xlane.f32.xlu0 %v832_v13 }
 0x36a   :  { %v834_v14 = vpop.xlane.xlu0 %833 }
 0x36b   :  { %1110 = vrcp.f32 %v834_v14 }
 0x375   :  { %v1111_v15 = vpop.eup %1110 }
 0x376   :  { %v836_v16 = vmul.f32 %v1111_v15, %v832_v13 }
 0x378   :  { %v846_v17 = vrot.slane %v836_v16, 4 }
 0x37a   :  { %v847_v18 = vadd.f32 %v846_v17, %v836_v16 }
 0x37c   :  { %v848_v19 = vrot.slane %v847_v18, 2 }
 0x37e   :  { %v849_v20 = vadd.f32 %v848_v19, %v847_v18 }
 0x380   :  { %v850_v21 = vrot.slane %v849_v20, 1 }
 0x382   :  { %v851_v22 = vadd.f32 %v850_v21, %v849_v20 }
 0x384   :  { %v852_v24 = vmul.f32 0.125, %v851_v22 }
 0x386   :  { %v853_v4 = vadd.f32 %v852_v24, %v845_v23 }
 0x388   :  { %854 = vst [vmem:[%s1410_s7] sm:$0x1] %v853_v4 }

</bundles_post_ra>
